<compile_context>
chip_gen: v6e
topology: v6e:2x2x1
jax: 0.10.0
libtpu: 0.0.40
codegen_flags: <defaults>
</compile_context>

<pallas_src>
import jax
import jax.numpy as jnp
from jax.experimental import pallas as pl
from jax.experimental.pallas import tpu as pltpu

BN_EPS = 1e-5
LEAKY_SLOPE = 0.01   # PyTorch nn.LeakyReLU default
LANE = 128           # TPU lane width


def _round_up(n, m):
    return ((n + m - 1) // m) * m


def _bn_leaky_relu(h, gamma, beta):
    """Training-mode BatchNorm1d (biased batch variance) + LeakyReLU.

    Affine folded into a per-feature scale/shift so the full-tile work is
    just one multiply + one add (plus the stats reduction)."""
    mean = jnp.mean(h, axis=0, keepdims=True)                    # (1, D)
    centered = h - mean
    var = jnp.mean(centered * centered, axis=0, keepdims=True)   # (1, D)
    scale = jax.lax.rsqrt(var + BN_EPS) * gamma                  # (1, D)
    shift = beta - mean * scale                                  # (1, D)
    y = h * scale + shift
    return jnp.where(y >= 0.0, y, LEAKY_SLOPE * y)


def _make_encoder_kernel(n_pieces, n_layers):
    """Build the fused encoder kernel for a fixed (n_pieces, n_layers)."""

    def kernel(*refs):
        # Operand layout:
        #   [x_0 .. x_{P-1},                      input pieces (B, d_p)
        #    w0_0 .. w0_{P-1}, g0, beta0,         layer-0 W row-splits + BN affine
        #    (w_l, g_l, beta_l) for l=1..L-1,     remaining layers
        #    out]
        x_refs = refs[:n_pieces]
        w0_refs = refs[n_pieces:2 * n_pieces]
        g0_ref = refs[2 * n_pieces]
        bt0_ref = refs[2 * n_pieces + 1]
        rest = refs[2 * n_pieces + 2:]
        layer_refs = [tuple(rest[3 * i:3 * i + 3]) for i in range(n_layers - 1)]
        o_ref = rest[3 * (n_layers - 1)]

        # Layer 0: torch.cat(x, dim=1) @ W0 fused as a sum of per-piece
        # matmuls (MXU). Linear bias is omitted (cancels in train-mode BN).
        h = jnp.dot(x_refs[0][...], w0_refs[0][...],
                    preferred_element_type=jnp.float32)
        for p in range(1, n_pieces):
            h = h + jnp.dot(x_refs[p][...], w0_refs[p][...],
                            preferred_element_type=jnp.float32)
        a = _bn_leaky_relu(h, g0_ref[...], bt0_ref[...])

        # Remaining layers (static Python unroll — activation stays on-chip).
        for (w_ref, g_ref, bt_ref) in layer_refs:
            h = jnp.dot(a, w_ref[...], preferred_element_type=jnp.float32)
            a = _bn_leaky_relu(h, g_ref[...], bt_ref[...])

        o_ref[...] = a   # lane-dense (B, Dpad_last) store

    return kernel


def init_pose_vae_encoder_params(key, hidden_dimensions, previous_dim=4):
    """Unpadded, PyTorch-equivalent parameters.

    Per layer: (w (din,dout), b (1,dout), gamma (1,dout), beta (1,dout)).
    w is stored transposed vs PyTorch so the kernel computes x @ w."""
    params = []
    dim_in = previous_dim
    for dim in hidden_dimensions:
        key, kw, kb = jax.random.split(key, 3)
        bound = 1.0 / jnp.sqrt(jnp.float32(dim_in))   # nn.Linear default init
        w = jax.random.uniform(kw, (dim_in, dim), jnp.float32, -bound, bound)
        b = jax.random.uniform(kb, (1, dim), jnp.float32, -bound, bound)
        gamma = jnp.ones((1, dim), jnp.float32)       # BatchNorm1d weight
        beta = jnp.zeros((1, dim), jnp.float32)       # BatchNorm1d bias
        params.append((w, b, gamma, beta))
        dim_in = dim
    return params


def prepare_encoder_params(params, piece_dims):
    """One-time prep: lane-pad feature dims to 128, drop the (cancelled)
    Linear bias, split layer-0 W rows per input piece."""
    piece_dims = tuple(int(d) for d in piece_dims)
    n_layers = len(params)

    w0, _b0, g0, bt0 = params[0]
    din0, dout0 = w0.shape
    assert sum(piece_dims) == din0, "piece_dims must sum to previous_dim"
    dpad = _round_up(dout0, LANE)

    w0_pad = jnp.zeros((din0, dpad), jnp.float32).at[:, :dout0].set(w0)
    w0_pieces = []
    off = 0
    for d in piece_dims:
        w0_pieces.append(w0_pad[off:off + d, :])
        off += d
    g0_pad = jnp.zeros((1, dpad), jnp.float32).at[:, :dout0].set(g0)
    bt0_pad = jnp.zeros((1, dpad), jnp.float32).at[:, :dout0].set(bt0)

    flat = list(w0_pieces) + [g0_pad, bt0_pad]
    prev_real, prev_pad = dout0, dpad

    for (w, _b, g, bt) in params[1:]:
        din, dout = w.shape
        assert din == prev_real
        dpad = _round_up(dout, LANE)
        w_pad = jnp.zeros((prev_pad, dpad), jnp.float32).at[:din, :dout].set(w)
        g_pad = jnp.zeros((1, dpad), jnp.float32).at[:, :dout].set(g)
        bt_pad = jnp.zeros((1, dpad), jnp.float32).at[:, :dout].set(bt)
        flat += [w_pad, g_pad, bt_pad]
        prev_real, prev_pad = dout, dpad

    return {
        "flat": flat,
        "n_pieces": len(piece_dims),
        "n_layers": n_layers,
        "last_dim": prev_real,
        "out_pad": prev_pad,
    }


def pose_vae_encoder_forward(x_list, prepared):
    """Whole encoder forward = ONE pallas_call. Returns (B, last_dim)."""
    n_pieces = prepared["n_pieces"]
    assert len(x_list) == n_pieces
    x_ops = [x.astype(jnp.float32) for x in x_list]
    B = x_ops[0].shape[0]

    operands = x_ops + list(prepared["flat"])
    vmem = pl.BlockSpec(memory_space=pltpu.MemorySpace.VMEM)
    kernel = _make_encoder_kernel(n_pieces, prepared["n_layers"])

    out_padded = pl.pallas_call(
        kernel,
        out_shape=jax.ShapeDtypeStruct((B, prepared["out_pad"]), jnp.float32),
        in_specs=[vmem] * len(operands),
        out_specs=vmem,
    )(*operands)

    # Drop the lane padding (glue slice; padded columns are exactly zero).
    return out_padded[:, :prepared["last_dim"]]


def _reference_forward(x_list, params):
    """Pure-JAX reference with the ORIGINAL semantics (including the Linear
    bias) to verify both the fusion and the bias cancellation."""
    x = jnp.concatenate(x_list, axis=1).astype(jnp.float32)
    for (w, b, gamma, beta) in params:
        h = x @ w + b
        mean = jnp.mean(h, axis=0, keepdims=True)
        var = jnp.mean((h - mean) ** 2, axis=0, keepdims=True)
        y = (h - mean) / jnp.sqrt(var + BN_EPS) * gamma + beta
        x = jnp.where(y >= 0.0, y, LEAKY_SLOPE * y)
    return x


if __name__ == "__main__":
    key = jax.random.PRNGKey(0)

    hidden_dimensions = [32, 16]
    previous_dim = 4
    batch = 8

    kparams, kx1, kx2 = jax.random.split(key, 3)
    params = init_pose_vae_encoder_params(kparams, hidden_dimensions, previous_dim)

    # forward takes a list of tensors concatenated on dim=1: two (B, 2) pieces.
    x_list = [
        jax.random.normal(kx1, (batch, 2), jnp.float32),
        jax.random.normal(kx2, (batch, 2), jnp.float32),
    ]

    prepared = prepare_encoder_params(params, piece_dims=(2, 2))

    out = pose_vae_encoder_forward(x_list, prepared)
    out = jax.block_until_ready(out)

    ref = _reference_forward(x_list, params)
    assert out.shape == (batch, hidden_dimensions[-1])
    assert jnp.allclose(out, ref, atol=1e-4, rtol=1e-4), "mismatch vs reference"

    print("KERNEL_OK")
</pallas_src>

<mosaic_0001>
module attributes {stable_mosaic.version = 11 : i64} {
  func.func @kernel(%arg0: memref<8x2xf32, #tpu.memory_space<vmem>>, %arg1: memref<8x2xf32, #tpu.memory_space<vmem>>, %arg2: memref<2x128xf32, #tpu.memory_space<vmem>>, %arg3: memref<2x128xf32, #tpu.memory_space<vmem>>, %arg4: memref<1x128xf32, #tpu.memory_space<vmem>>, %arg5: memref<1x128xf32, #tpu.memory_space<vmem>>, %arg6: memref<128x128xf32, #tpu.memory_space<vmem>>, %arg7: memref<1x128xf32, #tpu.memory_space<vmem>>, %arg8: memref<1x128xf32, #tpu.memory_space<vmem>>, %arg9: memref<8x128xf32, #tpu.memory_space<vmem>>) attributes {dimension_semantics = [], scalar_prefetch = 0 : i64, scratch_operands = 0 : i64, tpu.core_type = #tpu.core_type<tc>} {
    %c0 = arith.constant 0 : index
    %c0_0 = arith.constant 0 : index
    %0 = vector.load %arg0[%c0, %c0_0] : memref<8x2xf32, #tpu.memory_space<vmem>>, vector<8x2xf32>
    %c0_1 = arith.constant 0 : index
    %c0_2 = arith.constant 0 : index
    %1 = vector.load %arg2[%c0_1, %c0_2] : memref<2x128xf32, #tpu.memory_space<vmem>>, vector<2x128xf32>
    %cst = arith.constant dense<0.000000e+00> : vector<8x128xf32>
    %2 = tpu.matmul %0, %1, %cst {dimension_numbers = #tpu.dot_dimension_numbers<[1], [0], [0], [1], [0, 0, 1, 1], [], []>} : vector<8x2xf32>, vector<2x128xf32>, vector<8x128xf32> -> vector<8x128xf32>
    %c0_3 = arith.constant 0 : index
    %c0_4 = arith.constant 0 : index
    %3 = vector.load %arg1[%c0_3, %c0_4] : memref<8x2xf32, #tpu.memory_space<vmem>>, vector<8x2xf32>
    %c0_5 = arith.constant 0 : index
    %c0_6 = arith.constant 0 : index
    %4 = vector.load %arg3[%c0_5, %c0_6] : memref<2x128xf32, #tpu.memory_space<vmem>>, vector<2x128xf32>
    %cst_7 = arith.constant dense<0.000000e+00> : vector<8x128xf32>
    %5 = tpu.matmul %3, %4, %cst_7 {dimension_numbers = #tpu.dot_dimension_numbers<[1], [0], [0], [1], [0, 0, 1, 1], [], []>} : vector<8x2xf32>, vector<2x128xf32>, vector<8x128xf32> -> vector<8x128xf32>
    %6 = arith.addf %2, %5 : vector<8x128xf32>
    %c0_8 = arith.constant 0 : index
    %c0_9 = arith.constant 0 : index
    %7 = vector.load %arg4[%c0_8, %c0_9] : memref<1x128xf32, #tpu.memory_space<vmem>>, vector<1x128xf32>
    %c0_10 = arith.constant 0 : index
    %c0_11 = arith.constant 0 : index
    %8 = vector.load %arg5[%c0_10, %c0_11] : memref<1x128xf32, #tpu.memory_space<vmem>>, vector<1x128xf32>
    %cst_12 = arith.constant dense<0.000000e+00> : vector<128xf32>
    %9 = vector.multi_reduction <add>, %6, %cst_12 [0] : vector<8x128xf32> to vector<128xf32>
    %10 = vector.shape_cast %9 : vector<128xf32> to vector<1x128xf32>
    %cst_13 = arith.constant 8.000000e+00 : f32
    %11 = vector.broadcast %cst_13 : f32 to vector<1x128xf32>
    %12 = arith.divf %10, %11 : vector<1x128xf32>
    %13 = vector.broadcast %12 : vector<1x128xf32> to vector<8x128xf32>
    %14 = arith.subf %6, %13 : vector<8x128xf32>
    %15 = arith.mulf %14, %14 : vector<8x128xf32>
    %cst_14 = arith.constant dense<0.000000e+00> : vector<128xf32>
    %16 = vector.multi_reduction <add>, %15, %cst_14 [0] : vector<8x128xf32> to vector<128xf32>
    %17 = vector.shape_cast %16 : vector<128xf32> to vector<1x128xf32>
    %cst_15 = arith.constant 8.000000e+00 : f32
    %18 = vector.broadcast %cst_15 : f32 to vector<1x128xf32>
    %19 = arith.divf %17, %18 : vector<1x128xf32>
    %cst_16 = arith.constant 9.99999974E-6 : f32
    %20 = vector.broadcast %cst_16 : f32 to vector<1x128xf32>
    %21 = arith.addf %19, %20 : vector<1x128xf32>
    %22 = math.rsqrt %21 : vector<1x128xf32>
    %23 = arith.mulf %22, %7 : vector<1x128xf32>
    %24 = arith.mulf %12, %23 : vector<1x128xf32>
    %25 = arith.subf %8, %24 : vector<1x128xf32>
    %26 = vector.broadcast %23 : vector<1x128xf32> to vector<8x128xf32>
    %27 = arith.mulf %6, %26 : vector<8x128xf32>
    %28 = vector.broadcast %25 : vector<1x128xf32> to vector<8x128xf32>
    %29 = arith.addf %27, %28 : vector<8x128xf32>
    %cst_17 = arith.constant 0.000000e+00 : f32
    %30 = vector.broadcast %cst_17 : f32 to vector<8x128xf32>
    %31 = arith.cmpf oge, %29, %30 : vector<8x128xf32>
    %cst_18 = arith.constant 0.00999999977 : f32
    %32 = vector.broadcast %cst_18 : f32 to vector<8x128xf32>
    %33 = arith.mulf %32, %29 : vector<8x128xf32>
    %34 = arith.select %31, %29, %33 : vector<8x128xi1>, vector<8x128xf32>
    %c0_19 = arith.constant 0 : index
    %c0_20 = arith.constant 0 : index
    %35 = vector.load %arg6[%c0_19, %c0_20] : memref<128x128xf32, #tpu.memory_space<vmem>>, vector<128x128xf32>
    %cst_21 = arith.constant dense<0.000000e+00> : vector<8x128xf32>
    %36 = tpu.matmul %34, %35, %cst_21 {dimension_numbers = #tpu.dot_dimension_numbers<[1], [0], [0], [1], [0, 0, 1, 1], [], []>} : vector<8x128xf32>, vector<128x128xf32>, vector<8x128xf32> -> vector<8x128xf32>
    %c0_22 = arith.constant 0 : index
    %c0_23 = arith.constant 0 : index
    %37 = vector.load %arg7[%c0_22, %c0_23] : memref<1x128xf32, #tpu.memory_space<vmem>>, vector<1x128xf32>
    %c0_24 = arith.constant 0 : index
    %c0_25 = arith.constant 0 : index
    %38 = vector.load %arg8[%c0_24, %c0_25] : memref<1x128xf32, #tpu.memory_space<vmem>>, vector<1x128xf32>
    %cst_26 = arith.constant dense<0.000000e+00> : vector<128xf32>
    %39 = vector.multi_reduction <add>, %36, %cst_26 [0] : vector<8x128xf32> to vector<128xf32>
    %40 = vector.shape_cast %39 : vector<128xf32> to vector<1x128xf32>
    %cst_27 = arith.constant 8.000000e+00 : f32
    %41 = vector.broadcast %cst_27 : f32 to vector<1x128xf32>
    %42 = arith.divf %40, %41 : vector<1x128xf32>
    %43 = vector.broadcast %42 : vector<1x128xf32> to vector<8x128xf32>
    %44 = arith.subf %36, %43 : vector<8x128xf32>
    %45 = arith.mulf %44, %44 : vector<8x128xf32>
    %cst_28 = arith.constant dense<0.000000e+00> : vector<128xf32>
    %46 = vector.multi_reduction <add>, %45, %cst_28 [0] : vector<8x128xf32> to vector<128xf32>
    %47 = vector.shape_cast %46 : vector<128xf32> to vector<1x128xf32>
    %cst_29 = arith.constant 8.000000e+00 : f32
    %48 = vector.broadcast %cst_29 : f32 to vector<1x128xf32>
    %49 = arith.divf %47, %48 : vector<1x128xf32>
    %cst_30 = arith.constant 9.99999974E-6 : f32
    %50 = vector.broadcast %cst_30 : f32 to vector<1x128xf32>
    %51 = arith.addf %49, %50 : vector<1x128xf32>
    %52 = math.rsqrt %51 : vector<1x128xf32>
    %53 = arith.mulf %52, %37 : vector<1x128xf32>
    %54 = arith.mulf %42, %53 : vector<1x128xf32>
    %55 = arith.subf %38, %54 : vector<1x128xf32>
    %56 = vector.broadcast %53 : vector<1x128xf32> to vector<8x128xf32>
    %57 = arith.mulf %36, %56 : vector<8x128xf32>
    %58 = vector.broadcast %55 : vector<1x128xf32> to vector<8x128xf32>
    %59 = arith.addf %57, %58 : vector<8x128xf32>
    %cst_31 = arith.constant 0.000000e+00 : f32
    %60 = vector.broadcast %cst_31 : f32 to vector<8x128xf32>
    %61 = arith.cmpf oge, %59, %60 : vector<8x128xf32>
    %cst_32 = arith.constant 0.00999999977 : f32
    %62 = vector.broadcast %cst_32 : f32 to vector<8x128xf32>
    %63 = arith.mulf %62, %59 : vector<8x128xf32>
    %64 = arith.select %61, %59, %63 : vector<8x128xi1>, vector<8x128xf32>
    %c0_33 = arith.constant 0 : index
    %c0_34 = arith.constant 0 : index
    %65 = vector.load %arg9[%c0_33, %c0_34] : memref<8x128xf32, #tpu.memory_space<vmem>>, vector<8x128xf32>
    tpu.vector_store %arg9[%c0_33, %c0_34], %64 {strides = array<i32>} : memref<8x128xf32, #tpu.memory_space<vmem>>, vector<8x128xf32>,
    return
  }
}

</mosaic_0001>

<bundles_post_ra>
// kernel: tpu_custom_call.1
= control target key start
LH: loop header
LB: loop body
LE: loop exit
PB: predicated region body
PF: predicated region fallthrough
CT: control target
= control target key end

     0   :  { %14 = vsyncpa [#allocation3], 0  ;;  %s594_s0 = inlined_call_operand.vmem [shape: f32[8,2], index: 0, kind: input, shape index: {}]   ;;  %s595_s1 = inlined_call_operand.vmem [shape: f32[8,2], index: 1, kind: input, shape index: {}]   ;;  %s596_s2 = inlined_call_operand.vmem [shape: f32[2,128], index: 2, kind: input, shape index: {}]   ;;  %s597_s3 = inlined_call_operand.vmem [shape: f32[2,128], index: 3, kind: input, shape index: {}]   ;;  %s598_s4 = inlined_call_operand.vmem [shape: f32[1,128], index: 4, kind: input, shape index: {}]   ;;  %s599_s5 = inlined_call_operand.vmem [shape: f32[1,128], index: 5, kind: input, shape index: {}]   ;;  %s600_s6 = inlined_call_operand.hbm [shape: f32[128,128], index: 6, kind: input, shape index: {}]   ;;  %s601_s7 = inlined_call_operand.vmem [shape: f32[1,128], index: 7, kind: input, shape index: {}]   ;;  %s602_s8 = inlined_call_operand.vmem [shape: f32[1,128], index: 8, kind: input, shape index: {}]   ;;  %s603_s9 = inlined_call_operand.hbm [shape: f32[8,128], index: 9, kind: output, shape index: {}]  }
   0x1   :  { %15 = vsyncpa [#allocation4], 0  ;;  %s508_s30 = smov [#allocation2]  }
   0x2   :  { %s33_s10 = sshll.u32 %s508_s30, 4  ;;  %s34_s10 = int_to_ptr.vmem [resolvable:$true] %s33_s10 }
   0x3   :  { %s472_s11 = scalar_lea.vmem %s34_s10, 2048  ;;  %p477_p1 = scmp.lt.s32.totalorder %s34_s10, %s34_s10 }
   0x4   :  { %p473_p0 = scmp.ne.s32.totalorder %s34_s10, %s472_s11  ;;  %p478_p2 = scmp.lt.s32.totalorder %s472_s11, %s472_s11 }
   0x6   :  { %p479_p3 = por %p478_p2, %p477_p1 }
   0x8   :  { %p480_p4 = pnand %p479_p3, %p473_p0 }
   0xa   :  { %483 = shalt.err (!%p480_p4)
}
   0xb   :  { %s509_s12 = smov 128   ;;  %s510_s13 = smov 8  }
   0xc   :  { %39 = dma.hbm_to_vmem [thread:$0]  %s600_s6, 2048, %s34_s10, [#allocation3], %s509_s12, %s509_s12, %s510_s13  }
   0xd   :  { %504 = dma.done.wait [#allocation3], 2048  }
   0xe   :  { %505 = vsyncadd [#allocation3], 4294965248  ;;  %v511_v0 = vmov 0.0   ;;  %vm512_vm0 = vmmov 0   ;;  %vm55_vm1 = vcmask 1041408   ;;  %vm51_vm2 = vcmask 15360  }
   0xf   :  { %409 = vmatprep.subr.mxu1 %v511_v0  ;;  %411 = vmatprep.mubr.msk.f32.mxu1 %vm512_vm0, %v511_v0  ;;  %v50_v1 = vld [vmem:[%s597_s3] sm:$0x3]  ;;  %v259_v5 = vld [vmem:[#allocation2 + $0x78] sm:$0xff]  ;;  %v258_v6 = vld [vmem:[#allocation2 + $0x70] sm:$0xff]  ;;  %v229_v43 = vlaneseq  ;;  %s513_s25 = smov [#allocation5]  }
  0x10   :  { %419 = vmatprep.subr.mxu0 %v511_v0  ;;  %451 = vmatprep.mubr.msk.f32.mxu0 %vm512_vm0, %v511_v0  ;;  %v49_v2 = vld [vmem:[%s595_s1] sm:$0xff]  ;;  %v257_v7 = vld [vmem:[#allocation2 + $0x68] sm:$0xff]  ;;  %v255_v9 = vld [vmem:[#allocation2 + $0x58] sm:$0xff]  ;;  %s375_s26 = sshll.u32 %s513_s25, 4  ;;  %s376_s26 = int_to_ptr.vmem [resolvable:$true] %s375_s26 }
  0x11   :  { %v48_v3 = vld [vmem:[%s596_s2] sm:$0x3]  ;;  %410 = vmatpush3.msk.msra.mxu1 %vm55_vm1, %v50_v1  ;;  %420 = vmatpush3.msra.mxu0 %v259_v5  ;;  %v254_v10 = vld [vmem:[#allocation2 + $0x50] sm:$0xff]  ;;  %v253_v11 = vld [vmem:[#allocation2 + $0x48] sm:$0xff]  ;;  %v230_v44 = vshrl.u32 %v229_v43, 7  ;;  %p489_p6 = scmp.lt.s32.totalorder %s376_s26, %s376_s26 }
  0x12   :  { %412 = vmatmul.mubr.msk.f32.vlgmr.msra.gmra.mxu1 %vm51_vm2, %v49_v2  ;;  %414 = vmatprep.subr.mxu1 %v511_v0  ;;  %v47_v4 = vld [vmem:[%s594_s0] sm:$0xff]  ;;  %v251_v13 = vld [vmem:[#allocation2 + $0x38] sm:$0xff]  ;;  %v250_v14 = vld [vmem:[#allocation2 + $0x30] sm:$0xff] }
  0x13   :  { %415 = vmatpush3.msk.msra.mxu1 %vm55_vm1, %v48_v3  ;;  %416 = vmatprep.mubr.msk.f32.mxu1 %vm512_vm0, %v511_v0  ;;  %v256_v8 = vld [vmem:[#allocation2 + $0x60] sm:$0xff]  ;;  %v249_v15 = vld [vmem:[#allocation2 + $0x28] sm:$0xff]  ;;  %v247_v17 = vld [vmem:[#allocation2 + $0x18] sm:$0xff]  ;;  %v231_v46 = vsub.s32 0, %v230_v44 }
  0x14   :  { %421 = vmatprep.subr.mxu0 %v511_v0  ;;  %v252_v12 = vld [vmem:[#allocation2 + $0x40] sm:$0xff]  ;;  %v246_v18 = vld [vmem:[#allocation2 + $0x10] sm:$0xff]  ;;  %v245_v19 = vld [vmem:[#allocation2 + $0x8] sm:$0xff] }
  0x15   :  { %422 = vmatpush3.msra.mxu0 %v258_v6  ;;  %v248_v16 = vld [vmem:[#allocation2 + $0x20] sm:$0xff] }
  0x16   :  { %417 = vmatmul.mubr.msk.f32.vlgmr.msra.gmra.mxu1 %vm51_vm2, %v47_v4  ;;  %423 = vmatprep.subr.mxu0 %v511_v0  ;;  %v244_v20 = vld [vmem:[#allocation2] sm:$0xff] }
  0x17   :  { %424 = vmatpush3.msra.mxu0 %v257_v7  ;;  %v205_v45 = vld [vmem:[%s598_s4] sm:$0x1] }
  0x18   :  { %425 = vmatprep.subr.mxu0 %v511_v0  ;;  %v206_v49 = vld [vmem:[%s599_s5] sm:$0x1] }
  0x19   :  { %426 = vmatpush3.msra.mxu0 %v256_v8 }
  0x1a   :  { %427 = vmatprep.subr.mxu0 %v511_v0 }
  0x1b   :  { %428 = vmatpush3.msra.mxu0 %v255_v9 }
  0x1c   :  { %429 = vmatprep.subr.mxu0 %v511_v0 }
  0x1d   :  { %430 = vmatpush3.msra.mxu0 %v254_v10 }
  0x1e   :  { %431 = vmatprep.subr.mxu0 %v511_v0 }
  0x1f   :  { %432 = vmatpush3.msra.mxu0 %v253_v11 }
  0x20   :  { %433 = vmatprep.subr.mxu0 %v511_v0 }
  0x21   :  { %434 = vmatpush3.msra.mxu0 %v252_v12 }
  0x22   :  { %435 = vmatprep.subr.mxu0 %v511_v0 }
  0x23   :  { %436 = vmatpush3.msra.mxu0 %v251_v13  ;;  %v330_v13 = vld [vmem:[%s601_s7] sm:$0x1]  ;;  %s484_s7 = scalar_lea.vmem %s376_s26, 128 }
  0x24   :  { %437 = vmatprep.subr.mxu0 %v511_v0  ;;  %p485_p5 = scmp.ne.s32.totalorder %s376_s26, %s484_s7  ;;  %p490_p7 = scmp.lt.s32.totalorder %s484_s7, %s484_s7 }
  0x25   :  { %438 = vmatpush3.msra.mxu0 %v250_v14 }
  0x26   :  { %439 = vmatprep.subr.mxu0 %v511_v0  ;;  %p491_p8 = por %p490_p7, %p489_p6 }
  0x27   :  { %440 = vmatpush3.msra.mxu0 %v249_v15 }
  0x28   :  { %441 = vmatprep.subr.mxu0 %v511_v0  ;;  %p492_p9 = pnand %p491_p8, %p485_p5 }
  0x29   :  { %442 = vmatpush3.msra.mxu0 %v248_v16  ;;  %v331_v16 = vld [vmem:[%s602_s8] sm:$0x1] }
  0x2a   :  { %443 = vmatprep.subr.mxu0 %v511_v0 }
  0x2b   :  { %444 = vmatpush3.msra.mxu0 %v247_v17 }
  0x2c   :  { %445 = vmatprep.subr.mxu0 %v511_v0 }
  0x2d   :  { %446 = vmatpush3.msra.mxu0 %v246_v18 }
  0x2e   :  { %447 = vmatprep.subr.mxu0 %v511_v0 }
  0x2f   :  { %448 = vmatpush3.msra.mxu0 %v245_v19 }
  0x30   :  { %449 = vmatprep.subr.mxu0 %v511_v0 }
  0x31   :  { %450 = vmatpush3.msra.mxu0 %v244_v20 }
  0xd2   :  { %v125_v21 = vpop.f32.mrf.mxu1 }
  0xd4   :  { %v413_v22 = vpop.f32.mrf.mxu1 }
  0xd6   :  { %v201_v23 = vpop.f32.mrf.mxu1 }
  0xd7   :  { %v202_v24 = vadd.f32 %v201_v23, %v125_v21 }
  0xd8   :  { %v418_v25 = vpop.f32.mrf.mxu1 }
  0xd9   :  { %v207_v26 = vrot.slane %v202_v24, 4 }
  0xdb   :  { %v208_v27 = vadd.f32 %v207_v26, %v202_v24 }
  0xdd   :  { %v209_v28 = vrot.slane %v208_v27, 2 }
  0xdf   :  { %v210_v29 = vadd.f32 %v209_v28, %v208_v27 }
  0xe1   :  { %v211_v30 = vrot.slane %v210_v29, 1 }
  0xe3   :  { %v212_v31 = vadd.f32 %v211_v30, %v210_v29 }
  0xe5   :  { %v214_v32 = vmul.f32 0.125, %v212_v31 }
  0xe7   :  { %v215_v33 = vsub.f32 %v202_v24, %v214_v32 }
  0xe9   :  { %v216_v34 = vmul.f32 %v215_v33, %v215_v33 }
  0xeb   :  { %v217_v35 = vrot.slane %v216_v34, 4 }
  0xed   :  { %v218_v36 = vadd.f32 %v217_v35, %v216_v34 }
  0xef   :  { %v219_v37 = vrot.slane %v218_v36, 2 }
  0xf1   :  { %v220_v38 = vadd.f32 %v219_v37, %v218_v36 }
  0xf3   :  { %v221_v39 = vrot.slane %v220_v38, 1 }
  0xf5   :  { %v222_v40 = vadd.f32 %v221_v39, %v220_v38 }
  0xf7   :  { %v223_v41 = vmul.f32 0.125, %v222_v40 }
  0xf9   :  { %v224_v42 = vadd.f32 1e-05, %v223_v41 }
  0xfb   :  { %460 = vrsqrt.f32 %v224_v42 }
 0x108   :  { %v461_v47 = vpop.eup %460 }
 0x109   :  { %v226_v48 = vmul.f32 %v461_v47, %v205_v45 }
 0x10b   :  { %v227_v50 = vmul.f32 %v226_v48, %v214_v32  ;;  %v232_v51 = vrot.slane %v226_v48, %v231_v46 }
 0x10d   :  { %v228_v52 = vsub.f32 %v206_v49, %v227_v50  ;;  %v233_v53 = vmul.f32 %v232_v51, %v202_v24 }
 0x10f   :  { %v238_v54 = vrot.slane %v228_v52, %v231_v46 }
 0x111   :  { %v240_v55 = vadd.f32 %v238_v54, %v233_v53 }
 0x113   :  { %vm241_vm3 = vcmp.ge.f32.partialorder %v240_v55, 0.0  ;;  %v242_v56 = vmul.f32 0.01, %v240_v55 }
 0x115   :  { %v243_v57 = vsel %vm241_vm3, %v240_v55, %v242_v56 }
 0x116   :  { %452 = vmatmul.mubr.f32.vlgmr.msra.gmra.mxu0 %v243_v57 }
 0x1d6   :  { %v326_v58 = vpop.f32.mrf.mxu0 }
 0x1d7   :  { %v332_v59 = vrot.slane %v326_v58, 4 }
 0x1d8   :  { %v453_v60 = vpop.f32.mrf.mxu0 }
 0x1d9   :  { %v333_v61 = vadd.f32 %v332_v59, %v326_v58 }
 0x1db   :  { %v334_v62 = vrot.slane %v333_v61, 2 }
 0x1dd   :  { %v335_v63 = vadd.f32 %v334_v62, %v333_v61 }
 0x1df   :  { %v336_v0 = vrot.slane %v335_v63, 1 }
 0x1e1   :  { %v337_v1 = vadd.f32 %v336_v0, %v335_v63 }
 0x1e3   :  { %v338_v2 = vmul.f32 0.125, %v337_v1 }
 0x1e5   :  { %v339_v3 = vsub.f32 %v326_v58, %v338_v2 }
 0x1e7   :  { %v340_v4 = vmul.f32 %v339_v3, %v339_v3 }
 0x1e9   :  { %v341_v5 = vrot.slane %v340_v4, 4 }
 0x1eb   :  { %v342_v6 = vadd.f32 %v341_v5, %v340_v4 }
 0x1ed   :  { %v343_v7 = vrot.slane %v342_v6, 2 }
 0x1ef   :  { %v344_v8 = vadd.f32 %v343_v7, %v342_v6 }
 0x1f1   :  { %v345_v9 = vrot.slane %v344_v8, 1 }
 0x1f3   :  { %v346_v10 = vadd.f32 %v345_v9, %v344_v8 }
 0x1f5   :  { %v347_v11 = vmul.f32 0.125, %v346_v10 }
 0x1f7   :  { %v348_v12 = vadd.f32 1e-05, %v347_v11 }
 0x1f9   :  { %462 = vrsqrt.f32 %v348_v12 }
 0x206   :  { %v463_v14 = vpop.eup %462 }
 0x207   :  { %v350_v15 = vmul.f32 %v463_v14, %v330_v13 }
 0x209   :  { %v351_v17 = vmul.f32 %v350_v15, %v338_v2  ;;  %v356_v18 = vrot.slane %v350_v15, %v231_v46 }
 0x20b   :  { %v352_v19 = vsub.f32 %v331_v16, %v351_v17  ;;  %v357_v20 = vmul.f32 %v356_v18, %v326_v58 }
 0x20d   :  { %v362_v21 = vrot.slane %v352_v19, %v231_v46 }
 0x20f   :  { %v364_v22 = vadd.f32 %v362_v21, %v357_v20 }
 0x211   :  { %vm365_vm4 = vcmp.ge.f32.partialorder %v364_v22, 0.0  ;;  %v366_v23 = vmul.f32 0.01, %v364_v22 }
 0x213   :  { %v367_v24 = vsel %vm365_vm4, %v364_v22, %v366_v23 }
 0x214   :  { %368 = vst [vmem:[#allocation5] sm:$0xff] %v367_v24 }
 0x215   :  { %495 = shalt.err (!%p492_p9)
}
 0x216   :  { %378 = dma.vmem_to_hbm [thread:$0]  %s376_s26, 128, %s603_s9, [#allocation4]  }
 0x217   :  { %506 = dma.done.wait [#allocation4], 128  }
 0x218   :  { %507 = vsyncadd [#allocation4], 4294967168 }
 0x219   :  { %382 = vsyncpa [#allocation3], 1 }
 0x21a   :  { %383 = vsyncpa [#allocation4], 1 }

</bundles_post_ra>
